<compile_context>
chip_gen: v7x
topology: tpu7x:2x2x1
jax: 0.10.0
libtpu: 0.0.40
codegen_flags: <defaults>
</compile_context>

<pallas_src>
import functools

import numpy as np
import jax
import jax.numpy as jnp
from jax import lax
from jax.experimental import pallas as pl
from jax.experimental.pallas import tpu as pltpu

_LANES = 128
_SUBLANES = 8
_LOG_2PI = float(np.log(2.0 * np.pi))
_LOG2_E = float(np.log2(np.e))


def _sublane_pack(itemsize):
    # Sublane packing multiple per dtype width: f32 -> 8, bf16 -> 16, int8 -> 32.
    return {4: 8, 2: 16, 1: 32}.get(int(itemsize), 8)


# ----------------------------------------------------------------------------
# Kernel: accumulate sum(z^2) of an (R, 128) block into an (8, 128) f32 tile.
# ----------------------------------------------------------------------------
def _sumsq_kernel(z_ref, out_ref, *, chunk_rows, n_chunks):
    # z_ref  : (R, 128) block of the flattened tensor (original dtype)
    # out_ref: (8, 128) f32 accumulator, resident across the reduction grid axis
    k = pl.program_id(1)

    @pl.when(k == 0)
    def _():
        out_ref[...] = jnp.zeros_like(out_ref)

    def chunk_sum(c, acc):
        r0 = pl.multiple_of(c * chunk_rows, chunk_rows)
        x = z_ref[pl.ds(r0, chunk_rows), :].astype(jnp.float32)   # cast on-chip
        # Fold chunk rows into 8 sublanes: (chunk//8, 8, 128) keeps (8,128) vreg
        # tiles intact, so the axis-0 sum is pure element-wise vreg adds.
        y = (x * x).reshape(chunk_rows // _SUBLANES, _SUBLANES, _LANES)
        return acc + jnp.sum(y, axis=0)

    zero = jnp.zeros((_SUBLANES, _LANES), jnp.float32)
    if n_chunks == 1:
        acc = chunk_sum(0, zero)
    else:
        acc = lax.fori_loop(0, n_chunks, chunk_sum, zero, unroll=2)
    out_ref[...] += acc


def _sumsq_pallas(z2, R, P, num_k, chunk_rows):
    itemsize = int(jnp.dtype(z2.dtype).itemsize)
    block_bytes = R * _LANES * itemsize
    covered_rows = P * num_k * R

    kern = functools.partial(
        _sumsq_kernel, chunk_rows=chunk_rows, n_chunks=R // chunk_rows)

    partial_sums = pl.pallas_call(
        kern,
        out_shape=jax.ShapeDtypeStruct((P, _SUBLANES, _LANES), jnp.float32),
        grid=(P, num_k),
        in_specs=[
            pl.BlockSpec((R, _LANES), lambda p, k: (p * num_k + k, 0)),
        ],
        out_specs=pl.BlockSpec((None, _SUBLANES, _LANES), lambda p, k: (p, 0, 0)),
        compiler_params=pltpu.CompilerParams(
            dimension_semantics=("parallel", "arbitrary"),
            # 2x double-buffered input block + accumulators + slack; stays within
            # every generation's scoped/physical VMEM (incl. v7x 64 MiB).
            vmem_limit_bytes=max(32 * 1024 * 1024,
                                 int(2.5 * block_bytes) + (4 << 20)),
        ),
        cost_estimate=pl.CostEstimate(
            flops=2 * covered_rows * _LANES,
            transcendentals=0,
            bytes_accessed=covered_rows * _LANES * itemsize
                           + P * _SUBLANES * _LANES * 4,
        ),
    )(z2)
    return jnp.sum(partial_sums, dtype=jnp.float32)


# ----------------------------------------------------------------------------
# Wrapper: dispatch, tiling, ragged-edge handling, scalar finalize.
# ----------------------------------------------------------------------------
def _sumsq_xla(x):
    xf = x.astype(jnp.float32)
    return jnp.sum(xf * xf, dtype=jnp.float32)


def _finalize_4d(total_sumsq, det_J, B, D):
    # mean_b(bpd_b) = -(mean(det_J) + mean(log_pz)) * log2(e) / D
    # mean(log_pz)  = -0.5 * total_sumsq / B - 0.5 * log(2*pi) * D
    total_sumsq = total_sumsq.astype(jnp.float32)
    mean_det_j = jnp.mean(det_J.astype(jnp.float32).reshape(-1))
    mean_log_pz = (-0.5 / B) * total_sumsq - jnp.float32(0.5 * _LOG_2PI * D)
    return -(mean_det_j + mean_log_pz) * jnp.float32(_LOG2_E / D)


def nll_forward(z, det_J, *, max_block_bytes=8 * 1024 * 1024,
                min_pallas_bytes=256 * 1024):
    z = jnp.asarray(z)
    det_J = jnp.asarray(det_J)

    if z.ndim <= 2:
        # 2-D branch: MVN(0, I_2).log_prob on a lane-width-2 array; a Pallas
        # kernel would be pure launch + DMA overhead, so plain XLA.
        zf = z.astype(jnp.float32)
        dj = det_J.astype(jnp.float32).reshape(-1)
        log_pz = -0.5 * jnp.sum(zf * zf, axis=-1) - jnp.float32(_LOG_2PI)
        return jnp.mean(-log_pz + dj)

    B = int(z.shape[0])
    D = int(np.prod(z.shape[1:]))
    N = B * D
    itemsize = int(jnp.dtype(z.dtype).itemsize)

    # Tiny inputs: kernel launch + pipeline warm-up would dominate; XLA is fine.
    if N * itemsize < min_pallas_bytes:
        return _finalize_4d(_sumsq_xla(z), det_J, B, D)

    z_flat = z.reshape(-1)                      # free (contiguous)
    tail = N % _LANES
    extra_sumsq = jnp.float32(0.0)
    if tail:
        # Rare for RealNVP shapes (D = C*H*W): costs one aligned copy of the
        # main part plus a tiny XLA reduction of the < 128-element tail.
        extra_sumsq = extra_sumsq + _sumsq_xla(z_flat[N - tail:])
        z_flat = z_flat[: N - tail]
    rows = (N - tail) // _LANES
    z2 = z_flat.reshape(rows, _LANES)           # free, lane-dense view

    pack = _sublane_pack(itemsize)
    r_target = max(pack, (max_block_bytes // (_LANES * itemsize)) // pack * pack)
    R = int(min(r_target, max(pack, (rows // pack) * pack)))
    total_blocks = rows // R

    if total_blocks == 0:
        return _finalize_4d(_sumsq_xla(z2) + extra_sumsq, det_J, B, D)

    # >= 2-extent parallel axis when possible so a v7x megacore uses both TCs.
    P = 2 if total_blocks >= 2 else 1
    covered_blocks = (total_blocks // P) * P
    num_k = covered_blocks // P
    covered_rows = covered_blocks * R

    if covered_rows < rows:
        # Leftover (< 2 blocks of rows): tiny XLA reduction, no pad copy of z.
        extra_sumsq = extra_sumsq + _sumsq_xla(z2[covered_rows:])

    # In-kernel chunk size: <= 128 rows (vreg-resident f32 temp), divides R.
    chunk_rows = max(pack, (min(R, 128) // pack) * pack)
    while R % chunk_rows:
        chunk_rows -= pack

    total_sumsq = _sumsq_pallas(z2, R, P, num_k, chunk_rows) + extra_sumsq
    return _finalize_4d(total_sumsq, det_J, B, D)


# ----------------------------------------------------------------------------
# Pure-JAX reference for verification.
# ----------------------------------------------------------------------------
def nll_ref(z, det_J):
    z = jnp.asarray(z, jnp.float32)
    det_J = jnp.asarray(det_J, jnp.float32)
    log_2pi = jnp.log(jnp.float32(2.0 * np.pi))
    if z.ndim > 2:
        axes = tuple(range(1, z.ndim))
        log_pz = jnp.sum(-0.5 * z * z - 0.5 * log_2pi, axis=axes)
        log_px = det_J + log_pz
        nll = -log_px
        bpd = nll * np.log2(np.exp(1)) / np.prod(z.shape[1:])
        return bpd.mean()
    else:
        log_pz = -0.5 * jnp.sum(z * z, axis=-1) - log_2pi
        return (-log_pz + det_J).mean()


if __name__ == "__main__":
    key = jax.random.PRNGKey(0)
    keys = jax.random.split(key, 12)

    # ---- 4-D case (B, C, H, W) = (2, 4, 16, 16), f32, single-block kernel ----
    z4 = jax.random.normal(keys[0], (2, 4, 16, 16), dtype=jnp.float32)
    detJ4 = jax.random.normal(keys[1], (2,), dtype=jnp.float32)
    out4 = jax.block_until_ready(nll_forward(z4, detJ4, min_pallas_bytes=0))
    ref4 = nll_ref(z4, detJ4)
    np.testing.assert_allclose(np.asarray(out4), np.asarray(ref4),
                               rtol=1e-4, atol=1e-5)

    # ---- same inputs through the small-input XLA fallback (default threshold) ----
    out4f = jax.block_until_ready(nll_forward(z4, detJ4))
    np.testing.assert_allclose(np.asarray(out4f), np.asarray(ref4),
                               rtol=1e-4, atol=1e-5)

    # ---- bf16 input streamed in its original dtype ----
    z4b = z4.astype(jnp.bfloat16)
    out4b = jax.block_until_ready(nll_forward(z4b, detJ4, min_pallas_bytes=0))
    ref4b = nll_ref(z4b, detJ4)
    np.testing.assert_allclose(np.asarray(out4b), np.asarray(ref4b),
                               rtol=1e-4, atol=1e-4)

    # ---- D not a multiple of 128 (ragged tail + leftover rows handled in XLA) ----
    z4p = jax.random.normal(keys[2], (2, 3, 17, 19), dtype=jnp.float32)
    detJ4p = jax.random.normal(keys[3], (2,), dtype=jnp.float32)
    out4p = jax.block_until_ready(nll_forward(z4p, detJ4p, min_pallas_bytes=0))
    ref4p = nll_ref(z4p, detJ4p)
    np.testing.assert_allclose(np.asarray(out4p), np.asarray(ref4p),
                               rtol=1e-4, atol=1e-5)

    # ---- multi-block grid: parallel axis P=2, reduction axis num_k=3 ----
    z4m = jax.random.normal(keys[4], (4, 3, 32, 32), dtype=jnp.float32)  # rows=96
    detJ4m = jax.random.normal(keys[5], (4,), dtype=jnp.float32)
    out4m = jax.block_until_ready(
        nll_forward(z4m, detJ4m, max_block_bytes=16 * 128 * 4, min_pallas_bytes=0))
    ref4m = nll_ref(z4m, detJ4m)
    np.testing.assert_allclose(np.asarray(out4m), np.asarray(ref4m),
                               rtol=1e-4, atol=1e-5)

    # ---- larger single block exercising the in-kernel chunked fori_loop ----
    z4l = jax.random.normal(keys[6], (8, 4, 32, 32), dtype=jnp.float32)  # rows=256
    detJ4l = jax.random.normal(keys[7], (8,), dtype=jnp.float32)
    out4l = jax.block_until_ready(nll_forward(z4l, detJ4l, min_pallas_bytes=0))
    ref4l = nll_ref(z4l, detJ4l)
    np.testing.assert_allclose(np.asarray(out4l), np.asarray(ref4l),
                               rtol=1e-4, atol=1e-5)

    # ---- 2-D case (B, 2): MVN(0, I_2) branch (plain XLA) ----
    z2d = jax.random.normal(keys[8], (8, 2), dtype=jnp.float32)
    detJ2 = jax.random.normal(keys[9], (8,), dtype=jnp.float32)
    out2 = jax.block_until_ready(nll_forward(z2d, detJ2))
    ref2 = nll_ref(z2d, detJ2)
    np.testing.assert_allclose(np.asarray(out2), np.asarray(ref2),
                               rtol=1e-5, atol=1e-6)

    print("KERNEL_OK")
</pallas_src>

<mosaic_0001>
module attributes {stable_mosaic.version = 11 : i64} {
  func.func @_sumsq_kernel(%arg0: i32, %arg1: i32, %arg2: memref<16x128xf32, #tpu.memory_space<vmem>>, %arg3: memref<1x8x128xf32, #tpu.memory_space<vmem>>) attributes {dimension_semantics = [#tpu.dimension_semantics<parallel>, #tpu.dimension_semantics<arbitrary>], iteration_bounds = array<i64: 1, 1>, scalar_prefetch = 0 : i64, scratch_operands = 0 : i64, tpu.core_type = #tpu.core_type<tc>, window_params = [{transform_indices = @transform_0, window_bounds = array<i64: 16, 128>}, {transform_indices = @transform_1, window_bounds = array<i64: 1, 8, 128>}]} {
    %c0_i32 = arith.constant 0 : i32
    %0 = arith.cmpi eq, %arg1, %c0_i32 : i32
    %1 = arith.extui %0 : i1 to i32
    %c0_i32_0 = arith.constant 0 : i32
    %2 = arith.cmpi ne, %1, %c0_i32_0 : i32
    scf.if %2 {
      %cst_9 = arith.constant 0.000000e+00 : f32
      %17 = vector.broadcast %cst_9 : f32 to vector<8x128xf32>
      %c0_10 = arith.constant 0 : index
      %c0_11 = arith.constant 0 : index
      %c0_12 = arith.constant 0 : index
      %18 = vector.load %arg3[%c0_10, %c0_11, %c0_12] : memref<1x8x128xf32, #tpu.memory_space<vmem>>, vector<1x8x128xf32>
      %19 = vector.shape_cast %18 : vector<1x8x128xf32> to vector<8x128xf32>
      %20 = vector.shape_cast %17 : vector<8x128xf32> to vector<1x8x128xf32>
      tpu.vector_store %arg3[%c0_10, %c0_11, %c0_12], %20 {strides = array<i32>} : memref<1x8x128xf32, #tpu.memory_space<vmem>>, vector<1x8x128xf32>,
    } else {
    }
    %cst = arith.constant 0.000000e+00 : f32
    %3 = vector.broadcast %cst : f32 to vector<8x128xf32>
    %c0_i32_1 = arith.constant 0 : i32
    %4 = tpu.assume_multiple %c0_i32_1, 16 : i32
    %5 = arith.index_cast %4 : i32 to index
    %c0 = arith.constant 0 : index
    %6 = vector.load %arg2[%5, %c0] : memref<16x128xf32, #tpu.memory_space<vmem>>, vector<16x128xf32>
    %7 = arith.mulf %6, %6 : vector<16x128xf32>
    %8 = vector.shape_cast %7 : vector<16x128xf32> to vector<2x8x128xf32>
    %cst_2 = arith.constant dense<0.000000e+00> : vector<8x128xf32>
    %9 = vector.multi_reduction <add>, %8, %cst_2 [0] : vector<2x8x128xf32> to vector<8x128xf32>
    %10 = arith.addf %3, %9 : vector<8x128xf32>
    %c0_3 = arith.constant 0 : index
    %c0_4 = arith.constant 0 : index
    %c0_5 = arith.constant 0 : index
    %11 = vector.load %arg3[%c0_3, %c0_4, %c0_5] : memref<1x8x128xf32, #tpu.memory_space<vmem>>, vector<1x8x128xf32>
    %12 = vector.shape_cast %11 : vector<1x8x128xf32> to vector<8x128xf32>
    %13 = arith.addf %12, %10 : vector<8x128xf32>
    %c0_6 = arith.constant 0 : index
    %c0_7 = arith.constant 0 : index
    %c0_8 = arith.constant 0 : index
    %14 = vector.load %arg3[%c0_6, %c0_7, %c0_8] : memref<1x8x128xf32, #tpu.memory_space<vmem>>, vector<1x8x128xf32>
    %15 = vector.shape_cast %14 : vector<1x8x128xf32> to vector<8x128xf32>
    %16 = vector.shape_cast %13 : vector<8x128xf32> to vector<1x8x128xf32>
    tpu.vector_store %arg3[%c0_6, %c0_7, %c0_8], %16 {strides = array<i32>} : memref<1x8x128xf32, #tpu.memory_space<vmem>>, vector<1x8x128xf32>,
    return
  }
  func.func @transform_0(%arg0: i32, %arg1: i32) -> (i32, i32) {
    %c1_i32 = arith.constant 1 : i32
    %0 = arith.muli %arg0, %c1_i32 : i32
    %1 = arith.addi %0, %arg1 : i32
    %c0_i32 = arith.constant 0 : i32
    %c0_i32_0 = arith.constant 0 : i32
    return %1, %c0_i32 : i32, i32
  }
  func.func @transform_1(%arg0: i32, %arg1: i32) -> (i32, i32, i32) {
    %c0_i32 = arith.constant 0 : i32
    %c0_i32_0 = arith.constant 0 : i32
    %c0_i32_1 = arith.constant 0 : i32
    return %arg0, %c0_i32, %c0_i32_0 : i32, i32, i32
  }
}

</mosaic_0001>

<bundles_post_ra>
// kernel: tpu_custom_call.1
= control target key start
LH: loop header
LB: loop body
LE: loop exit
PB: predicated region body
PF: predicated region fallthrough
CT: control target
= control target key end

     0   :  { %6 = vsyncpa [#allocation3], 0  ;;  %s149_s0 = inlined_call_operand.hbm [shape: f32[16,128], index: 0, kind: input, shape index: {}]   ;;  %s150_s1 = inlined_call_operand.hbm [shape: f32[1,8,128], index: 1, kind: output, shape index: {}]  }
   0x1   :  { %7 = vsyncpa [#allocation4], 0  ;;  %s111_s6 = smov [#allocation2]   ;;  %s63_s10 = scalar_lea.hbm %s149_s0, 256 }
   0x2   :  { %s17_s7 = sshll.u32 %s111_s6, 4  ;;  %p64_p0 = scmp.ne.s32.totalorder %s149_s0, %s63_s10  ;;  %s18_s7 = int_to_ptr.vmem [resolvable:$true] %s17_s7 }
   0x3   :  { %p67_p1 = scmp.lt.u32.totalorder %s63_s10, %s149_s0 }
   0x5   :  { %p69_p2 = pnand %p67_p1, %p64_p0 }
   0x7   :  { %72 = shalt.err (!%p69_p2)
}
   0x8   :  { %s73_s15 = scalar_lea.vmem %s18_s7, 256  ;;  %p78_p4 = scmp.lt.s32.totalorder %s18_s7, %s18_s7 }
   0x9   :  { %p74_p3 = scmp.ne.s32.totalorder %s18_s7, %s73_s15  ;;  %p79_p5 = scmp.lt.s32.totalorder %s73_s15, %s73_s15 }
   0xb   :  { %p80_p6 = por %p79_p5, %p78_p4 }
   0xd   :  { %p81_p7 = pnand %p80_p6, %p74_p3 }
   0xf   :  { %84 = shalt.err (!%p81_p7)
}
  0x10   :  { %s112_s16 = smov 128   ;;  %s113_s17 = smov 8  }
  0x11   :  { %23 = dma.hbm_to_vmem [thread:$0]  %s149_s0, 256, %s18_s7, [#allocation3], %s112_s16, %s112_s16, %s113_s17  }
  0x12   :  { %107 = dma.done.wait [#allocation3], 256  }
  0x13   :  { %108 = vsyncadd [#allocation3], 4294967040  ;;  %v34_v0 = vld [vmem:[#allocation2] sm:$0xff]  ;;  %v35_v1 = vld [vmem:[#allocation2 + $0x8] sm:$0xff]  ;;  %s114_s20 = smov [#allocation5]  }
  0x14   :  { %v36_v2 = vmul.f32 %v34_v0, %v34_v0  ;;  %v37_v3 = vmul.f32 %v35_v1, %v35_v1  ;;  %s49_s21 = sshll.u32 %s114_s20, 4  ;;  %s50_s21 = int_to_ptr.vmem [resolvable:$true] %s49_s21 }
  0x15   :  { %s85_s22 = scalar_lea.vmem %s50_s21, 128  ;;  %p90_p9 = scmp.lt.s32.totalorder %s50_s21, %s50_s21 }
  0x16   :  { %v38_v4 = vadd.f32 %v37_v3, %v36_v2  ;;  %p86_p8 = scmp.ne.s32.totalorder %s50_s21, %s85_s22  ;;  %p91_p10 = scmp.lt.s32.totalorder %s85_s22, %s85_s22 }
  0x18   :  { %42 = vst [vmem:[#allocation5] sm:$0xff] %v38_v4  ;;  %p92_p11 = por %p91_p10, %p90_p9 }
  0x1a   :  { %p93_p12 = pnand %p92_p11, %p86_p8 }
  0x1c   :  { %96 = shalt.err (!%p93_p12)
}
  0x1d   :  { %s97_s24 = scalar_lea.hbm %s150_s1, 128 }
  0x1e   :  { %p98_p13 = scmp.ne.s32.totalorder %s150_s1, %s97_s24  ;;  %p101_p0 = scmp.lt.u32.totalorder %s97_s24, %s150_s1 }
  0x20   :  { %p103_p1 = pnand %p101_p0, %p98_p13 }
  0x22   :  { %106 = shalt.err (!%p103_p1)
}
  0x23   :  { %52 = dma.vmem_to_hbm [thread:$0]  %s50_s21, 128, %s150_s1, [#allocation4]  }
  0x24   :  { %109 = dma.done.wait [#allocation4], 128  }
  0x25   :  { %110 = vsyncadd [#allocation4], 4294967168 }
  0x26   :  { %56 = vsyncpa [#allocation3], 1 }
  0x27   :  { %57 = vsyncpa [#allocation4], 1 }

</bundles_post_ra>
